<compile_context>
chip_gen: v7x
topology: tpu7x:2x2x1
jax: 0.10.0
libtpu: 0.0.40
codegen_flags: <defaults>
</compile_context>

<pallas_src>
import jax
import jax.numpy as jnp
from jax.experimental import pallas as pl
from jax.experimental.pallas import tpu as pltpu


# Lane-dense last dim: multiple of 128 so every vreg / store line is full.
_LANES = 512


def _identity_kernel(x_ref, o_ref):
    # Abstract base class: forward is identity.
    #
    # Template note for subclasses (v5e has a single vector-store slot):
    # write results directly into o_ref rather than staging through an extra
    # VMEM scratch — doubling stores makes the compute stage vst-slot bound
    # on v5e once real feature math is dropped in here.
    o_ref[...] = x_ref[...]


def _round_up(x: int, m: int) -> int:
    return (x + m - 1) // m * m


def _vmem_capacity_bytes() -> int:
    """Per-core VMEM capacity; falls back to 128 MiB (v5e/v6e) if unqueryable."""
    try:
        info = pltpu.get_tpu_info()
        cap = int(getattr(info, "vmem_capacity_bytes", 0) or 0)
        if cap > 0:
            return cap
    except Exception:
        pass
    return 128 << 20


def base_feature_extractor_forward(x: jnp.ndarray,
                                   *,
                                   target_block_bytes: int = 8 << 20,
                                   min_kernel_bytes: int = 256 << 10) -> jnp.ndarray:
    """Identity forward of BaseFeatureExtractor as a tiled, lane-dense Pallas kernel.

    Works for arbitrary input shapes/dtypes; returns an array with identical
    shape, dtype and values.
    """
    orig_shape = x.shape
    dtype = x.dtype
    total = int(x.size)
    if total == 0:
        return x
    itemsize = jnp.dtype(dtype).itemsize

    # Small-input fast path: dispatch + reshape overhead dominates below a few
    # hundred KiB; the op is a pure identity, so just return the input.
    if total * itemsize < min_kernel_bytes:
        return x

    # ---- lane-dense 2-D view: (rows_needed, _LANES) -----------------------
    rows_needed = pl.cdiv(total, _LANES)

    # Sublane granule: 8 rows for 32-bit, 16 for 16-bit, 32 for 8-bit dtypes
    # (sub-32-bit dtypes pack along sublanes).
    sublane = max(8, 32 // itemsize)

    # Block rows from a byte budget, capped so the double-buffered working set
    # (2 arrays x 2 buffers) plus ~16 MiB headroom fits per-core VMEM on every
    # generation (v7x: 64 MiB; v5e/v6e: 128 MiB).
    vmem_cap = _vmem_capacity_bytes()
    block_bytes_budget = min(target_block_bytes, max(1 << 20, (vmem_cap - (16 << 20)) // 4))
    block_rows = max(sublane,
                     (block_bytes_budget // (_LANES * itemsize)) // sublane * sublane)

    # Prefer >= 2 grid steps so the "parallel" axis can shard across both
    # TensorCores on v7x (negligible cost on single-TC chips).
    if rows_needed > 2 * sublane:
        block_rows = min(block_rows, _round_up(pl.cdiv(rows_needed, 2), sublane))

    # Tiny tensors: a single full-extent block (block shape == array shape is
    # always legal, even when not a multiple of the sublane granule).
    if block_rows >= rows_needed:
        block_rows = rows_needed

    # Pad only up to the next lane multiple (<= 511 elements); clean shapes
    # skip the pad and the trailing slice entirely.
    padded_total = rows_needed * _LANES
    flat = x.reshape(-1)
    needs_pad = padded_total != total
    if needs_pad:
        flat = jnp.pad(flat, (0, padded_total - total))
    x2d = flat.reshape(rows_needed, _LANES)

    grid = (pl.cdiv(rows_needed, block_rows),)   # ragged last block handled by Pallas

    block_bytes = block_rows * _LANES * itemsize
    vmem_limit = int(min(int(0.75 * vmem_cap),
                         max(32 << 20, 4 * block_bytes + (8 << 20))))

    out2d = pl.pallas_call(
        _identity_kernel,
        out_shape=jax.ShapeDtypeStruct((rows_needed, _LANES), dtype),
        grid_spec=pltpu.PrefetchScalarGridSpec(
            num_scalar_prefetch=0,
            grid=grid,
            in_specs=[pl.BlockSpec((block_rows, _LANES), lambda i: (i, 0))],
            out_specs=pl.BlockSpec((block_rows, _LANES), lambda i: (i, 0)),
        ),
        compiler_params=pltpu.CompilerParams(
            dimension_semantics=("parallel",),
            vmem_limit_bytes=vmem_limit,
        ),
        cost_estimate=pl.CostEstimate(
            flops=0, transcendentals=0, bytes_accessed=2 * total * itemsize),
    )(x2d)

    out_flat = out2d.reshape(-1)
    if needs_pad:
        out_flat = out_flat[:total]
    return out_flat.reshape(orig_shape)


if __name__ == "__main__":
    key = jax.random.PRNGKey(0)

    # Small NCHW input consistent with a feature-extractor forward.  Force the
    # kernel path (min_kernel_bytes=0) so the Pallas kernel actually runs.
    x = jax.random.normal(key, (2, 4, 16, 16), dtype=jnp.float32)
    y = jax.block_until_ready(base_feature_extractor_forward(x, min_kernel_bytes=0))
    assert y.shape == x.shape and y.dtype == x.dtype
    assert bool(jnp.all(y == x))

    # Awkward (non-lane-divisible) shape: exercises the <=511-element pad +
    # trailing-slice path through the kernel, still bit-exact.
    x2 = jax.random.normal(jax.random.PRNGKey(1), (1, 3, 7, 5), dtype=jnp.float32)
    y2 = jax.block_until_ready(base_feature_extractor_forward(x2, min_kernel_bytes=0))
    assert y2.shape == x2.shape and y2.dtype == x2.dtype
    assert bool(jnp.all(y2 == x2))

    # Moderate feature-map size: exceeds the small-input threshold, so it runs
    # through the default (multi-block, ragged-aware) kernel path.
    x3 = jax.random.normal(jax.random.PRNGKey(2), (4, 64, 32, 32), dtype=jnp.float32)
    y3 = jax.block_until_ready(base_feature_extractor_forward(x3))
    assert y3.shape == x3.shape and y3.dtype == x3.dtype
    assert bool(jnp.all(y3 == x3))

    # Small-input fast path (pure identity, no kernel dispatch).
    y4 = jax.block_until_ready(base_feature_extractor_forward(x))
    assert bool(jnp.all(y4 == x))

    print("KERNEL_OK")
</pallas_src>

<mosaic_0001>
module attributes {stable_mosaic.version = 11 : i64} {
  func.func @_identity_kernel(%arg0: i32, %arg1: memref<4x512xf32, #tpu.memory_space<vmem>>, %arg2: memref<4x512xf32, #tpu.memory_space<vmem>>) attributes {dimension_semantics = [#tpu.dimension_semantics<parallel>], iteration_bounds = array<i64: 1>, scalar_prefetch = 0 : i64, scratch_operands = 0 : i64, tpu.core_type = #tpu.core_type<tc>, window_params = [{transform_indices = @transform_0, window_bounds = array<i64: 4, 512>}, {transform_indices = @transform_1, window_bounds = array<i64: 4, 512>}]} {
    %c0 = arith.constant 0 : index
    %c0_0 = arith.constant 0 : index
    %0 = vector.load %arg1[%c0, %c0_0] : memref<4x512xf32, #tpu.memory_space<vmem>>, vector<4x512xf32>
    %c0_1 = arith.constant 0 : index
    %c0_2 = arith.constant 0 : index
    %1 = vector.load %arg2[%c0_1, %c0_2] : memref<4x512xf32, #tpu.memory_space<vmem>>, vector<4x512xf32>
    tpu.vector_store %arg2[%c0_1, %c0_2], %0 {strides = array<i32>} : memref<4x512xf32, #tpu.memory_space<vmem>>, vector<4x512xf32>,
    return
  }
  func.func @transform_0(%arg0: i32) -> (i32, i32) {
    %c0_i32 = arith.constant 0 : i32
    %c0_i32_0 = arith.constant 0 : i32
    return %arg0, %c0_i32 : i32, i32
  }
  func.func @transform_1(%arg0: i32) -> (i32, i32) {
    %c0_i32 = arith.constant 0 : i32
    %c0_i32_0 = arith.constant 0 : i32
    return %arg0, %c0_i32 : i32, i32
  }
}

</mosaic_0001>

<bundles_post_ra>
// kernel: tpu_custom_call.1
= control target key start
LH: loop header
LB: loop body
LE: loop exit
PB: predicated region body
PF: predicated region fallthrough
CT: control target
= control target key end

     0   :  { %6 = vsyncpa [#allocation3], 0  ;;  %s126_s0 = inlined_call_operand.hbm [shape: f32[4,512], index: 0, kind: input, shape index: {}]   ;;  %s127_s1 = inlined_call_operand.hbm [shape: f32[4,512], index: 1, kind: output, shape index: {}]  }
   0x1   :  { %7 = vsyncpa [#allocation4], 0  ;;  %s90_s6 = smov [#allocation2]   ;;  %s42_s10 = scalar_lea.hbm %s126_s0, 256 }
   0x2   :  { %s14_s7 = sshll.u32 %s90_s6, 4  ;;  %p43_p0 = scmp.ne.s32.totalorder %s126_s0, %s42_s10  ;;  %s15_s7 = int_to_ptr.vmem [resolvable:$true] %s14_s7 }
   0x3   :  { %p46_p1 = scmp.lt.u32.totalorder %s42_s10, %s126_s0 }
   0x5   :  { %p48_p2 = pnand %p46_p1, %p43_p0 }
   0x7   :  { %51 = shalt.err (!%p48_p2)
}
   0x8   :  { %s52_s15 = scalar_lea.vmem %s15_s7, 256  ;;  %p57_p4 = scmp.lt.s32.totalorder %s15_s7, %s15_s7 }
   0x9   :  { %p53_p3 = scmp.ne.s32.totalorder %s15_s7, %s52_s15  ;;  %p58_p5 = scmp.lt.s32.totalorder %s52_s15, %s52_s15 }
   0xb   :  { %p59_p6 = por %p58_p5, %p57_p4 }
   0xd   :  { %p60_p7 = pnand %p59_p6, %p53_p3 }
   0xf   :  { %63 = shalt.err (!%p60_p7)
}
  0x10   :  { %17 = dma.hbm_to_vmem [thread:$0]  %s126_s0, 256, %s15_s7, [#allocation3]  }
  0x11   :  { %86 = dma.done.wait [#allocation3], 256  }
  0x12   :  { %87 = vsyncadd [#allocation3], 4294967040  ;;  %s91_s18 = smov [#allocation5]   ;;  %v21_v0 = vld [vmem:[#allocation2] sm:$0xff]  ;;  %v22_v1 = vld [vmem:[#allocation2 + $0x8] sm:$0xff] }
  0x13   :  { %s31_s19 = sshll.u32 %s91_s18, 4  ;;  %23 = vst [vmem:[#allocation5] sm:$0xff] %v21_v0  ;;  %24 = vst [vmem:[#allocation5 + $0x8] sm:$0xff] %v22_v1  ;;  %s32_s19 = int_to_ptr.vmem [resolvable:$true] %s31_s19 }
  0x14   :  { %s64_s20 = scalar_lea.vmem %s32_s19, 256  ;;  %p69_p9 = scmp.lt.s32.totalorder %s32_s19, %s32_s19 }
  0x15   :  { %p65_p8 = scmp.ne.s32.totalorder %s32_s19, %s64_s20  ;;  %p70_p10 = scmp.lt.s32.totalorder %s64_s20, %s64_s20 }
  0x17   :  { %p71_p11 = por %p70_p10, %p69_p9 }
  0x19   :  { %p72_p12 = pnand %p71_p11, %p65_p8 }
  0x1b   :  { %75 = shalt.err (!%p72_p12)
}
  0x1c   :  { %s76_s0 = scalar_lea.hbm %s127_s1, 256 }
  0x1d   :  { %p77_p13 = scmp.ne.s32.totalorder %s127_s1, %s76_s0  ;;  %p80_p0 = scmp.lt.u32.totalorder %s76_s0, %s127_s1 }
  0x1f   :  { %p82_p1 = pnand %p80_p0, %p77_p13 }
  0x21   :  { %85 = shalt.err (!%p82_p1)
}
  0x22   :  { %34 = dma.vmem_to_hbm [thread:$0]  %s32_s19, 256, %s127_s1, [#allocation4]  }
  0x23   :  { %88 = dma.done.wait [#allocation4], 256  }
  0x24   :  { %89 = vsyncadd [#allocation4], 4294967040 }
  0x25   :  { %38 = vsyncpa [#allocation3], 1 }
  0x26   :  { %39 = vsyncpa [#allocation4], 1 }

</bundles_post_ra>
